<compile_context>
chip_gen: v6e
topology: v6e:2x2x1
jax: 0.10.0
libtpu: 0.0.40
codegen_flags: <defaults>
</compile_context>

<pallas_src>
import jax
import jax.numpy as jnp
from jax.experimental import pallas as pl
from jax.experimental.pallas import tpu as pltpu

N_FEATURES = 63
N_H0 = 32
N_H1 = 16
N_OUT = 12

# Default batch tile.  2 x (tb*63*4) x-double-buffer + 2 x (tb*12*4) out buffers
# + ~11 KB weights ~= 5 MB at tb=8192 -> fits every generation's scoped default.
_DEFAULT_BLOCK_BATCH = 8192

_FLOPS_PER_ROW = 2 * (N_FEATURES * N_H0 + N_H0 * N_H1 + N_H1 * N_OUT)   # 2*2704
_WEIGHT_BYTES = 4 * (N_FEATURES * N_H0 + N_H0 + N_H0 * N_H1 + N_H1
                     + N_H1 * N_OUT + N_OUT)


def _leaky_relu(x, slope=0.2):
    # For slope < 1, LeakyReLU(x) == max(x, slope*x): one mul + one max.
    return jnp.maximum(x, slope * x)


def linearnet_kernel(x_ref, w0_ref, b0_ref, w1_ref, b1_ref, w2_ref, b2_ref, o_ref):
    # hidden0: Linear(63 -> 32) + LeakyReLU(0.2)   (Dropout = identity in eval)
    h0 = jnp.dot(x_ref[...], w0_ref[...], preferred_element_type=jnp.float32)
    h0 = _leaky_relu(h0 + b0_ref[...])
    # hidden1: Linear(32 -> 16) + LeakyReLU(0.2)
    h1 = jnp.dot(h0, w1_ref[...], preferred_element_type=jnp.float32)
    h1 = _leaky_relu(h1 + b1_ref[...])
    # out: Linear(16 -> 12)
    o = jnp.dot(h1, w2_ref[...], preferred_element_type=jnp.float32) + b2_ref[...]
    o_ref[...] = o.astype(o_ref.dtype)


def _round_up(n, m):
    return (n + m - 1) // m * m


def linearnet_forward(x, params, *, block_batch=_DEFAULT_BLOCK_BATCH, x_dtype=None):
    """x: (B, 63). params: dict of pre-transposed weights + (1, out) row biases.

    x_dtype: optional HBM storage dtype for x (e.g. jnp.bfloat16) to halve the
    dominant read stream; accumulation stays f32 and the output is f32.
    """
    w0, b0, w1, b1, w2, b2 = (
        params["w0"], params["b0"], params["w1"],
        params["b1"], params["w2"], params["b2"],
    )
    if x_dtype is not None and x.dtype != x_dtype:
        x = x.astype(x_dtype)
        w0 = w0.astype(x_dtype)   # keep the first dot a native low-precision MXU op

    B = x.shape[0]
    x_bytes = jnp.dtype(x.dtype).itemsize

    # Batch tile: multiple of 8 (sublane), capped so small batches use a single
    # (possibly partial) block.  No full-array padding: grid = cdiv(B, tb) and
    # Pallas masks the ragged last block's writeback; rows are independent, so
    # garbage tail rows never affect valid output rows.
    tb = max(8, min(_round_up(block_batch, 8), _round_up(B, 8)))
    grid = (pl.cdiv(B, tb),)

    # VMEM estimate: double-buffered x tile + double-buffered out tile + weights.
    vmem_needed = 2 * tb * N_FEATURES * x_bytes + 2 * tb * N_OUT * 4 + _WEIGHT_BYTES
    vmem_limit = None
    if vmem_needed > (12 << 20):      # only bump when nearing v5e's 16 MiB default
        vmem_limit = int(min(vmem_needed + (8 << 20), 100 << 20))

    out = pl.pallas_call(
        linearnet_kernel,
        out_shape=jax.ShapeDtypeStruct((B, N_OUT), jnp.float32),
        grid=grid,
        in_specs=[
            # x: tiled along batch (auto double-buffered by the pipeline).
            pl.BlockSpec((tb, N_FEATURES), lambda i: (i, 0)),
            # weights / biases: constant block index -> VMEM-resident, single DMA.
            pl.BlockSpec((N_FEATURES, N_H0), lambda i: (0, 0)),
            pl.BlockSpec((1, N_H0), lambda i: (0, 0)),
            pl.BlockSpec((N_H0, N_H1), lambda i: (0, 0)),
            pl.BlockSpec((1, N_H1), lambda i: (0, 0)),
            pl.BlockSpec((N_H1, N_OUT), lambda i: (0, 0)),
            pl.BlockSpec((1, N_OUT), lambda i: (0, 0)),
        ],
        out_specs=pl.BlockSpec((tb, N_OUT), lambda i: (i, 0)),
        compiler_params=pltpu.CompilerParams(
            dimension_semantics=("parallel",),
            vmem_limit_bytes=vmem_limit,
        ),
        cost_estimate=pl.CostEstimate(
            flops=B * _FLOPS_PER_ROW,
            transcendentals=0,
            bytes_accessed=B * (x_bytes * N_FEATURES + 4 * N_OUT) + _WEIGHT_BYTES,
        ),
    )(x, w0, b0, w1, b1, w2, b2)

    return out


def init_params(key):
    """PyTorch nn.Linear default init (U[-1/sqrt(in), 1/sqrt(in)]).

    Weights are stored pre-transposed: (in_features, out_features) so the kernel
    computes x @ W^T + b as x @ Wt + b.  Biases are (1, out_features) rows.
    """
    dims = [(N_FEATURES, N_H0), (N_H0, N_H1), (N_H1, N_OUT)]
    params = {}
    keys = jax.random.split(key, 2 * len(dims))
    for i, (fan_in, fan_out) in enumerate(dims):
        bound = 1.0 / jnp.sqrt(jnp.float32(fan_in))
        w = jax.random.uniform(keys[2 * i], (fan_in, fan_out),
                               minval=-bound, maxval=bound, dtype=jnp.float32)
        b = jax.random.uniform(keys[2 * i + 1], (1, fan_out),
                               minval=-bound, maxval=bound, dtype=jnp.float32)
        params[f"w{i}"] = w
        params[f"b{i}"] = b
    return params


def _ref(x, p):
    h = x @ p["w0"] + p["b0"]
    h = jnp.where(h > 0, h, 0.2 * h)
    h = h @ p["w1"] + p["b1"]
    h = jnp.where(h > 0, h, 0.2 * h)
    return h @ p["w2"] + p["b2"]


if __name__ == "__main__":
    key = jax.random.PRNGKey(0)
    pkey, xkey, xkey2, xkey3 = jax.random.split(key, 4)

    params = init_params(pkey)

    # 1) small demo batch (single grid step), exact f32 path
    batch = 8
    x = jax.random.normal(xkey, (batch, N_FEATURES), dtype=jnp.float32)
    out = jax.block_until_ready(linearnet_forward(x, params))
    expected = _ref(x, params)
    assert out.shape == (batch, N_OUT), out.shape
    assert jnp.allclose(out, expected, atol=1e-5, rtol=1e-5)

    # 2) ragged batch: B not a multiple of the tile, grid > 1, partial last block
    batch2 = 20
    x2 = jax.random.normal(xkey2, (batch2, N_FEATURES), dtype=jnp.float32)
    out2 = jax.block_until_ready(linearnet_forward(x2, params, block_batch=8))
    expected2 = _ref(x2, params)
    assert out2.shape == (batch2, N_OUT), out2.shape
    assert jnp.allclose(out2, expected2, atol=1e-5, rtol=1e-5)

    # 3) bf16 x storage path (halves the dominant HBM read stream); f32 accumulate.
    batch3 = 1024
    x3 = jax.random.normal(xkey3, (batch3, N_FEATURES), dtype=jnp.float32)
    out3 = jax.block_until_ready(
        linearnet_forward(x3, params, x_dtype=jnp.bfloat16))
    expected3 = _ref(x3, params)
    assert out3.shape == (batch3, N_OUT), out3.shape
    assert jnp.allclose(out3, expected3, atol=5e-2, rtol=5e-2)

    print("KERNEL_OK")
</pallas_src>

<mosaic_0001>
module attributes {stable_mosaic.version = 11 : i64} {
  func.func @linearnet_kernel(%arg0: i32, %arg1: memref<8x63xf32, #tpu.memory_space<vmem>>, %arg2: memref<63x32xf32, #tpu.memory_space<vmem>>, %arg3: memref<1x32xf32, #tpu.memory_space<vmem>>, %arg4: memref<32x16xf32, #tpu.memory_space<vmem>>, %arg5: memref<1x16xf32, #tpu.memory_space<vmem>>, %arg6: memref<16x12xf32, #tpu.memory_space<vmem>>, %arg7: memref<1x12xf32, #tpu.memory_space<vmem>>, %arg8: memref<8x12xf32, #tpu.memory_space<vmem>>) attributes {dimension_semantics = [#tpu.dimension_semantics<parallel>], iteration_bounds = array<i64: 1>, scalar_prefetch = 0 : i64, scratch_operands = 0 : i64, tpu.core_type = #tpu.core_type<tc>, window_params = [{transform_indices = @transform_0, window_bounds = array<i64: 8, 63>}, {pipeline_mode = #tpu.pipeline_mode<synchronous>, transform_indices = @transform_1, window_bounds = array<i64: 63, 32>}, {pipeline_mode = #tpu.pipeline_mode<synchronous>, transform_indices = @transform_2, window_bounds = array<i64: 1, 32>}, {pipeline_mode = #tpu.pipeline_mode<synchronous>, transform_indices = @transform_3, window_bounds = array<i64: 32, 16>}, {pipeline_mode = #tpu.pipeline_mode<synchronous>, transform_indices = @transform_4, window_bounds = array<i64: 1, 16>}, {pipeline_mode = #tpu.pipeline_mode<synchronous>, transform_indices = @transform_5, window_bounds = array<i64: 16, 12>}, {pipeline_mode = #tpu.pipeline_mode<synchronous>, transform_indices = @transform_6, window_bounds = array<i64: 1, 12>}, {transform_indices = @transform_7, window_bounds = array<i64: 8, 12>}]} {
    %c0 = arith.constant 0 : index
    %c0_0 = arith.constant 0 : index
    %0 = vector.load %arg1[%c0, %c0_0] : memref<8x63xf32, #tpu.memory_space<vmem>>, vector<8x63xf32>
    %c0_1 = arith.constant 0 : index
    %c0_2 = arith.constant 0 : index
    %1 = vector.load %arg2[%c0_1, %c0_2] : memref<63x32xf32, #tpu.memory_space<vmem>>, vector<63x32xf32>
    %cst = arith.constant dense<0.000000e+00> : vector<8x32xf32>
    %2 = tpu.matmul %0, %1, %cst {dimension_numbers = #tpu.dot_dimension_numbers<[1], [0], [0], [1], [0, 0, 1, 1], [], []>} : vector<8x63xf32>, vector<63x32xf32>, vector<8x32xf32> -> vector<8x32xf32>
    %c0_3 = arith.constant 0 : index
    %c0_4 = arith.constant 0 : index
    %3 = vector.load %arg3[%c0_3, %c0_4] : memref<1x32xf32, #tpu.memory_space<vmem>>, vector<1x32xf32>
    %4 = vector.broadcast %3 : vector<1x32xf32> to vector<8x32xf32>
    %5 = arith.addf %2, %4 : vector<8x32xf32>
    %cst_5 = arith.constant 2.000000e-01 : f32
    %6 = vector.broadcast %cst_5 : f32 to vector<8x32xf32>
    %7 = arith.mulf %6, %5 : vector<8x32xf32>
    %8 = arith.maximumf %5, %7 : vector<8x32xf32>
    %c0_6 = arith.constant 0 : index
    %c0_7 = arith.constant 0 : index
    %9 = vector.load %arg4[%c0_6, %c0_7] : memref<32x16xf32, #tpu.memory_space<vmem>>, vector<32x16xf32>
    %cst_8 = arith.constant dense<0.000000e+00> : vector<8x16xf32>
    %10 = tpu.matmul %8, %9, %cst_8 {dimension_numbers = #tpu.dot_dimension_numbers<[1], [0], [0], [1], [0, 0, 1, 1], [], []>} : vector<8x32xf32>, vector<32x16xf32>, vector<8x16xf32> -> vector<8x16xf32>
    %c0_9 = arith.constant 0 : index
    %c0_10 = arith.constant 0 : index
    %11 = vector.load %arg5[%c0_9, %c0_10] : memref<1x16xf32, #tpu.memory_space<vmem>>, vector<1x16xf32>
    %12 = vector.broadcast %11 : vector<1x16xf32> to vector<8x16xf32>
    %13 = arith.addf %10, %12 : vector<8x16xf32>
    %cst_11 = arith.constant 2.000000e-01 : f32
    %14 = vector.broadcast %cst_11 : f32 to vector<8x16xf32>
    %15 = arith.mulf %14, %13 : vector<8x16xf32>
    %16 = arith.maximumf %13, %15 : vector<8x16xf32>
    %c0_12 = arith.constant 0 : index
    %c0_13 = arith.constant 0 : index
    %17 = vector.load %arg6[%c0_12, %c0_13] : memref<16x12xf32, #tpu.memory_space<vmem>>, vector<16x12xf32>
    %cst_14 = arith.constant dense<0.000000e+00> : vector<8x12xf32>
    %18 = tpu.matmul %16, %17, %cst_14 {dimension_numbers = #tpu.dot_dimension_numbers<[1], [0], [0], [1], [0, 0, 1, 1], [], []>} : vector<8x16xf32>, vector<16x12xf32>, vector<8x12xf32> -> vector<8x12xf32>
    %c0_15 = arith.constant 0 : index
    %c0_16 = arith.constant 0 : index
    %19 = vector.load %arg7[%c0_15, %c0_16] : memref<1x12xf32, #tpu.memory_space<vmem>>, vector<1x12xf32>
    %20 = vector.broadcast %19 : vector<1x12xf32> to vector<8x12xf32>
    %21 = arith.addf %18, %20 : vector<8x12xf32>
    %c0_17 = arith.constant 0 : index
    %c0_18 = arith.constant 0 : index
    %22 = vector.load %arg8[%c0_17, %c0_18] : memref<8x12xf32, #tpu.memory_space<vmem>>, vector<8x12xf32>
    tpu.vector_store %arg8[%c0_17, %c0_18], %21 {strides = array<i32>} : memref<8x12xf32, #tpu.memory_space<vmem>>, vector<8x12xf32>,
    return
  }
  func.func @transform_0(%arg0: i32) -> (i32, i32) {
    %c0_i32 = arith.constant 0 : i32
    %c0_i32_0 = arith.constant 0 : i32
    return %arg0, %c0_i32 : i32, i32
  }
  func.func @transform_1(%arg0: i32) -> (i32, i32) {
    %c0_i32 = arith.constant 0 : i32
    %c0_i32_0 = arith.constant 0 : i32
    %c0_i32_1 = arith.constant 0 : i32
    return %c0_i32, %c0_i32_0 : i32, i32
  }
  func.func @transform_2(%arg0: i32) -> (i32, i32) {
    %c0_i32 = arith.constant 0 : i32
    %c0_i32_0 = arith.constant 0 : i32
    %c0_i32_1 = arith.constant 0 : i32
    return %c0_i32, %c0_i32_0 : i32, i32
  }
  func.func @transform_3(%arg0: i32) -> (i32, i32) {
    %c0_i32 = arith.constant 0 : i32
    %c0_i32_0 = arith.constant 0 : i32
    %c0_i32_1 = arith.constant 0 : i32
    return %c0_i32, %c0_i32_0 : i32, i32
  }
  func.func @transform_4(%arg0: i32) -> (i32, i32) {
    %c0_i32 = arith.constant 0 : i32
    %c0_i32_0 = arith.constant 0 : i32
    %c0_i32_1 = arith.constant 0 : i32
    return %c0_i32, %c0_i32_0 : i32, i32
  }
  func.func @transform_5(%arg0: i32) -> (i32, i32) {
    %c0_i32 = arith.constant 0 : i32
    %c0_i32_0 = arith.constant 0 : i32
    %c0_i32_1 = arith.constant 0 : i32
    return %c0_i32, %c0_i32_0 : i32, i32
  }
  func.func @transform_6(%arg0: i32) -> (i32, i32) {
    %c0_i32 = arith.constant 0 : i32
    %c0_i32_0 = arith.constant 0 : i32
    %c0_i32_1 = arith.constant 0 : i32
    return %c0_i32, %c0_i32_0 : i32, i32
  }
  func.func @transform_7(%arg0: i32) -> (i32, i32) {
    %c0_i32 = arith.constant 0 : i32
    %c0_i32_0 = arith.constant 0 : i32
    return %arg0, %c0_i32 : i32, i32
  }
}

</mosaic_0001>

<bundles_post_ra>
// kernel: tpu_custom_call.1
= control target key start
LH: loop header
LB: loop body
LE: loop exit
PB: predicated region body
PF: predicated region fallthrough
CT: control target
= control target key end

     0   :  { %vm47_vm0 = vcmask 1046528   ;;  %v395_v1 = vmov 0.0   ;;  %vm396_vm1 = vmmov 0   ;;  %s498_s0 = inlined_call_operand.vmem [shape: f32[8,63], index: 0, kind: input, shape index: {}]   ;;  %s499_s1 = inlined_call_operand.vmem [shape: f32[63,32], index: 1, kind: input, shape index: {}]   ;;  %s500_s2 = inlined_call_operand.vmem [shape: f32[1,32], index: 2, kind: input, shape index: {}]   ;;  %s501_s3 = inlined_call_operand.vmem [shape: f32[32,16], index: 3, kind: input, shape index: {}]   ;;  %s502_s4 = inlined_call_operand.vmem [shape: f32[1,16], index: 4, kind: input, shape index: {}]   ;;  %s503_s5 = inlined_call_operand.vmem [shape: f32[16,12], index: 5, kind: input, shape index: {}]   ;;  %s504_s6 = inlined_call_operand.vmem [shape: f32[1,12], index: 6, kind: input, shape index: {}]   ;;  %s505_s7 = inlined_call_operand.hbm [shape: f32[8,12], index: 7, kind: output, shape index: {}]  }
   0x1   :  { %v35_v0 = vld [vmem:[%s499_s1 + $0x38] sm:$0x7f]  ;;  %333 = vmatprep.subr.mxu0 %v395_v1  ;;  %v34_v2 = vld [vmem:[%s499_s1 + $0x30] sm:$0xff]  ;;  %352 = vmatprep.subr.mxu1 %v395_v1  ;;  %v33_v3 = vld [vmem:[%s499_s1 + $0x28] sm:$0xff] }
   0x2   :  { %334 = vmatpush3.msk.msra.mxu0 %vm47_vm0, %v35_v0  ;;  %349 = vmatprep.mubr.msk.f32.mxu0 %vm396_vm1, %v395_v1 }
   0x3   :  { %335 = vmatprep.subr.mxu0 %v395_v1  ;;  %360 = vmatprep.mubr.msk.f32.mxu1 %vm396_vm1, %v395_v1 }
   0x4   :  { %12 = vsyncpa [#allocation3], 0  ;;  %336 = vmatpush3.msra.mxu0 %v34_v2  ;;  %v32_v4 = vld [vmem:[%s499_s1 + $0x20] sm:$0xff]  ;;  %v31_v5 = vld [vmem:[%s499_s1 + $0x18] sm:$0xff]  ;;  %vm43_vm2 = vcmask 515072   ;;  %vm134_vm3 = vcmask 261120  }
   0x5   :  { %337 = vmatprep.subr.mxu0 %v395_v1  ;;  %v30_v6 = vld [vmem:[%s499_s1 + $0x10] sm:$0xff]  ;;  %v29_v7 = vld [vmem:[%s499_s1 + $0x8] sm:$0xff]  ;;  %v28_v8 = vld [vmem:[%s499_s1] sm:$0xff]  ;;  %vm219_vm4 = vcmask 130048   ;;  %s397_s10 = smov [#allocation2]   ;;  %vm293_vm5 = vcmask 97280  }
   0x6   :  { %338 = vmatpush3.msra.mxu0 %v33_v3  ;;  %v27_v9 = vld [vmem:[%s498_s0] sm:$0xff]  ;;  %v126_v10 = vld [vmem:[%s501_s3 + $0x18] sm:$0xff]  ;;  %v125_v11 = vld [vmem:[%s501_s3 + $0x10] sm:$0xff]  ;;  %s301_s11 = sshll.u32 %s397_s10, 4  ;;  %s302_s11 = int_to_ptr.vmem [resolvable:$true] %s301_s11 }
   0x7   :  { %339 = vmatprep.subr.mxu0 %v395_v1  ;;  %353 = vmatpush3.msra.mxu1 %v126_v10  ;;  %v124_v12 = vld [vmem:[%s501_s3 + $0x8] sm:$0xff]  ;;  %v123_v13 = vld [vmem:[%s501_s3] sm:$0xff]  ;;  %p378_p1 = scmp.lt.s32.totalorder %s302_s11, %s302_s11 }
   0x8   :  { %340 = vmatpush3.msra.mxu0 %v32_v4  ;;  %354 = vmatprep.subr.mxu1 %v395_v1  ;;  %v309_v14 = vld [vmem:[%s500_s2] ss:$0 sm:$0xff]  ;;  %v211_v20 = vld [vmem:[%s503_s5 + $0x8] sm:$0xff] }
   0x9   :  { %341 = vmatprep.subr.mxu0 %v395_v1  ;;  %355 = vmatpush3.msra.mxu1 %v125_v11  ;;  %v210_v21 = vld [vmem:[%s503_s5] sm:$0xff] }
   0xa   :  { %342 = vmatpush3.msra.mxu0 %v31_v5  ;;  %356 = vmatprep.subr.mxu1 %v395_v1  ;;  %v312_v22 = vld [vmem:[%s502_s4] ss:$0 sm:$0xff]  ;;  %s373_s4 = scalar_lea.vmem %s302_s11, 128 }
   0xb   :  { %343 = vmatprep.subr.mxu0 %v395_v1  ;;  %357 = vmatpush3.msra.mxu1 %v124_v12  ;;  %v314_v28 = vld [vmem:[%s504_s6] ss:$0 sm:$0xff]  ;;  %p374_p0 = scmp.ne.s32.totalorder %s302_s11, %s373_s4  ;;  %p379_p2 = scmp.lt.s32.totalorder %s373_s4, %s373_s4 }
   0xc   :  { %344 = vmatpush3.msra.mxu0 %v30_v6  ;;  %358 = vmatprep.subr.mxu1 %v395_v1 }
   0xd   :  { %345 = vmatprep.subr.mxu0 %v395_v1  ;;  %359 = vmatpush3.msra.mxu1 %v123_v13  ;;  %p380_p3 = por %p379_p2, %p378_p1 }
   0xe   :  { %346 = vmatpush3.msra.mxu0 %v29_v7  ;;  %363 = vmatprep.subr.mxu1 %v395_v1 }
   0xf   :  { %347 = vmatprep.subr.mxu0 %v395_v1  ;;  %p381_p4 = pnand %p380_p3, %p374_p0 }
  0x10   :  { %348 = vmatpush3.msra.mxu0 %v28_v8 }
  0x11   :  { %350 = vmatmul.mubr.msk.f32.vlgmr.msra.gmra.mxu0 %vm43_vm2, %v27_v9 }
  0xd1   :  { %v117_v15 = vpop.f32.mrf.mxu0 }
  0xd2   :  { %v118_v16 = vadd.f32 %v309_v14, %v117_v15 }
  0xd3   :  { %v351_v17 = vpop.f32.mrf.mxu0 }
  0xd4   :  { %v121_v18 = vmul.f32 0.2, %v118_v16 }
  0xd6   :  { %v122_v19 = vmax.f32 %v118_v16, %v121_v18 }
  0xd8   :  { %361 = vmatmul.mubr.msk.f32.vlgmr.msra.gmra.mxu1 %vm134_vm3, %v122_v19 }
  0xd9   :  { %367 = vmatprep.mubr.msk.f32.mxu1 %vm396_vm1, %v395_v1  ;;  %364 = vmatpush3.msra.mxu1 %v211_v20 }
  0xda   :  { %365 = vmatprep.subr.mxu1 %v395_v1 }
  0xdb   :  { %366 = vmatpush3.msra.mxu1 %v210_v21 }
 0x198   :  { %v204_v23 = vpop.f32.mrf.mxu1 }
 0x199   :  { %v205_v24 = vadd.f32 %v312_v22, %v204_v23 }
 0x19a   :  { %v362_v25 = vpop.f32.mrf.mxu1 }
 0x19b   :  { %v208_v26 = vmul.f32 0.2, %v205_v24 }
 0x19d   :  { %v209_v27 = vmax.f32 %v205_v24, %v208_v26 }
 0x19f   :  { %368 = vmatmul.mubr.msk.f32.vlgmr.msra.gmra.mxu1 %vm219_vm4, %v209_v27 }
 0x25f   :  { %v289_v29 = vpop.f32.mrf.mxu1 }
 0x260   :  { %v290_v30 = vadd.f32 %v314_v28, %v289_v29 }
 0x261   :  { %v369_v31 = vpop.f32.mrf.mxu1 }
 0x262   :  { %294 = vst.msk [vmem:[#allocation2] sm:$0xff] %vm293_vm5, %v290_v30 }
 0x263   :  { %384 = shalt.err (!%p381_p4)
}
 0x264   :  { %304 = dma.vmem_to_hbm [thread:$0]  %s302_s11, 128, %s505_s7, [#allocation3]  }
 0x265   :  { %393 = dma.done.wait [#allocation3], 128  }
 0x266   :  { %394 = vsyncadd [#allocation3], 4294967168 }
 0x267   :  { %308 = vsyncpa [#allocation3], 1 }

</bundles_post_ra>
